<compile_context>
chip_gen: v7x
topology: tpu7x:2x2x1
jax: 0.10.0
libtpu: 0.0.40
codegen_flags: <defaults>
</compile_context>

<pallas_src>
import jax
import jax.numpy as jnp
from jax import lax
from jax.experimental import pallas as pl
from jax.experimental.pallas import tpu as pltpu


LANE = 128


def _round_up(x, m):
    return ((x + m - 1) // m) * m


# ---------------------------------------------------------------------------
# Kernel
# ---------------------------------------------------------------------------
def critic_kernel(s_ref, a_ref, w1s_ref, w1a_ref, b1_ref,
                  w2_ref, b2_ref, w3_ref, b3_ref, out_ref):
    # fc1 on the implicitly concatenated input: two partial matmuls replace the
    # concat ([state, action] @ W1 == state @ W1_s + action @ W1_a).
    # MXU accumulates in f32; bias + ReLU in f32.
    h1 = (jnp.dot(s_ref[...], w1s_ref[...], preferred_element_type=jnp.float32)
          + jnp.dot(a_ref[...], w1a_ref[...], preferred_element_type=jnp.float32)
          + b1_ref[...])
    h1 = jnp.maximum(h1, 0.0)
    # TODO(synk): the two small-K fc1 matmuls could be merged into one via a
    # (tm, d_in_pad) VMEM scratch copy; minor unless fc1 is large.

    # fc2 + ReLU (feed the MXU in the compute dtype, accumulate in f32).
    h2 = jnp.dot(h1.astype(w2_ref.dtype), w2_ref[...],
                 preferred_element_type=jnp.float32) + b2_ref[...]
    h2 = jnp.maximum(h2, 0.0)

    # q1 head: contract the 1-row head weight against h2^T so the result is
    # emitted directly as a lane-dense (1, tm) row (no masked (tm,1) store and
    # no result transpose).  b3 is an SMEM scalar.
    q_row = lax.dot_general(w3_ref[...], h2, (((1,), (1,)), ((), ())),
                            preferred_element_type=jnp.float32) + b3_ref[0, 0]
    out_ref[...] = q_row[None].astype(out_ref.dtype)


# ---------------------------------------------------------------------------
# Tiling / budget helpers
# ---------------------------------------------------------------------------
def _vmem_budget_and_cores():
    """Generation-aware scoped-VMEM budget and TensorCore count (best effort)."""
    try:
        info = pltpu.get_tpu_info()
        physical = int(getattr(info, "vmem_capacity_bytes", 128 << 20))
    except Exception:
        physical = 64 << 20          # conservative fallback
    budget = max(16 << 20, min(physical // 2, 64 << 20))
    try:
        kind = jax.devices()[0].device_kind.lower()
    except Exception:
        kind = ""
    n_cores = 2 if ("v7" in kind or "v4" in kind) else 1
    return budget, n_cores


def _pick_block_m(batch, d_s, d_a, f1p, f2p, act_bytes, budget_bytes):
    """Largest batch tile (cap 1024) whose real VMEM footprint fits the budget.
    Accounts for lane/sublane padding of activation tiles, double-buffered
    inputs/output, single-buffered resident weights, and f32 intermediates."""
    f32 = 4
    sub = 16 if act_bytes == 2 else 8     # sublane packing of the compute dtype
    w_bytes = (_round_up(d_s, sub) * f1p * act_bytes       # W1_s  (resident, 1 buf)
               + _round_up(d_a, sub) * f1p * act_bytes     # W1_a
               + f1p * f2p * act_bytes                      # W2
               + 8 * f1p * f32                              # b1  (1,f1p) -> 8 sublanes
               + 2 * 8 * f2p * f32)                         # b2, w3_row
    d_s_l = _round_up(d_s, LANE)
    d_a_l = _round_up(d_a, LANE)

    tm = min(1024, _round_up(max(batch, 1), sub))
    while tm > sub:
        act = 2 * tm * (d_s_l + d_a_l) * act_bytes          # double-buffered inputs
        out = 2 * 8 * _round_up(tm, LANE) * f32              # double-buffered output
        inter = tm * (f1p + f2p) * f32                       # live h1 / h2
        if w_bytes + act + out + inter <= int(budget_bytes * 0.8):
            break
        tm = max(sub, _round_up(tm // 2, sub))
    return tm


# ---------------------------------------------------------------------------
# Wrapper
# ---------------------------------------------------------------------------
def critic_forward(state, action, prepared_params):
    """Forward pass. `prepared_params` comes from prepare_params()."""
    w1s, w1a, b1, w2, b2, w3_row, b3 = prepared_params
    compute_dtype = w1s.dtype
    act_bytes = jnp.dtype(compute_dtype).itemsize
    sub = 16 if act_bytes == 2 else 8

    state = state.astype(compute_dtype)
    action = action.astype(compute_dtype)
    B, d_s = state.shape
    d_a = action.shape[1]
    f1p = w1s.shape[1]
    f2p = w2.shape[1]

    budget, n_cores = _vmem_budget_and_cores()
    tm = _pick_block_m(B, d_s, d_a, f1p, f2p, act_bytes, budget)
    # Dual-TensorCore chips: make sure both cores get at least one tile when the
    # batch allows it.  Single-TC chips keep the fewest (largest) tiles.
    if n_cores > 1 and B > sub:
        tm = min(tm, _round_up(pl.cdiv(B, n_cores), sub))

    b_pad = _round_up(B, tm)
    if b_pad != B:
        state = jnp.pad(state, ((0, b_pad - B), (0, 0)))
        action = jnp.pad(action, ((0, b_pad - B), (0, 0)))
    n_tiles = b_pad // tm

    # Grid-invariant operands: VMEM-resident, single-buffered.
    resident = lambda arr: pl.BlockSpec(arr.shape, lambda i: (0, 0),
                                        pipeline_mode=pl.Buffered(1))

    weight_bytes = sum(int(a.size) * a.dtype.itemsize
                       for a in (w1s, w1a, b1, w2, b2, w3_row, b3))
    cost = pl.CostEstimate(
        flops=2 * B * ((d_s + d_a) * f1p + f1p * f2p + f2p),
        transcendentals=0,
        bytes_accessed=B * (d_s + d_a) * act_bytes + B * 4 + weight_bytes,
    )

    out = pl.pallas_call(
        critic_kernel,
        out_shape=jax.ShapeDtypeStruct((n_tiles, 1, tm), jnp.float32),
        grid_spec=pltpu.PrefetchScalarGridSpec(
            num_scalar_prefetch=0,
            grid=(n_tiles,),
            in_specs=[
                pl.BlockSpec((tm, d_s), lambda i: (i, 0)),   # state tile
                pl.BlockSpec((tm, d_a), lambda i: (i, 0)),   # action tile
                resident(w1s), resident(w1a), resident(b1),
                resident(w2), resident(b2), resident(w3_row),
                pl.BlockSpec(memory_space=pltpu.MemorySpace.SMEM),  # b3 scalar
            ],
            out_specs=pl.BlockSpec((1, 1, tm), lambda i: (i, 0, 0)),
        ),
        compiler_params=pltpu.CompilerParams(
            dimension_semantics=("parallel",),
            vmem_limit_bytes=int(budget),
        ),
        cost_estimate=cost,
    )(state, action, w1s, w1a, b1, w2, b2, w3_row, b3)

    return out.reshape(b_pad)[:B][:, None]


# ---------------------------------------------------------------------------
# Parameter init / layout prep / reference
# ---------------------------------------------------------------------------
def init_params(key, input_dims, n_actions, fc1_dims, fc2_dims):
    """nn.Linear-style init U(-1/sqrt(fan_in), 1/sqrt(fan_in)).
    Weights stored as (in_features, out_features) so y = x @ W + b."""
    def linear(k, fan_in, fan_out):
        kw, kb = jax.random.split(k)
        bound = 1.0 / jnp.sqrt(fan_in)
        w = jax.random.uniform(kw, (fan_in, fan_out), jnp.float32, -bound, bound)
        b = jax.random.uniform(kb, (1, fan_out), jnp.float32, -bound, bound)
        return w, b

    k1, k2, k3 = jax.random.split(key, 3)
    d_in = input_dims + n_actions
    w1, b1 = linear(k1, d_in, fc1_dims)
    w2, b2 = linear(k2, fc1_dims, fc2_dims)
    w3, b3 = linear(k3, fc2_dims, 1)
    return (w1, b1, w2, b2, w3, b3)


def prepare_params(params, input_dims, compute_dtype=jnp.bfloat16):
    """One-time layout transform: split W1 at `input_dims`, zero-pad hidden dims
    to a multiple of 128 lanes (exact: ReLU(0)=0, padded rows/cols are 0), cast
    matmul weights to the compute dtype (biases stay f32), store the head as a
    (1, fc2_p) row and b3 as a (1,1) SMEM scalar."""
    w1, b1, w2, b2, w3, b3 = params
    f1, f2 = w1.shape[1], w2.shape[1]
    f1p, f2p = _round_up(f1, LANE), _round_up(f2, LANE)

    w1p = jnp.pad(w1, ((0, 0), (0, f1p - f1)))
    b1p = jnp.pad(b1, ((0, 0), (0, f1p - f1)))
    w2p = jnp.pad(w2, ((0, f1p - f1), (0, f2p - f2)))
    b2p = jnp.pad(b2, ((0, 0), (0, f2p - f2)))
    w3_row = jnp.pad(w3, ((0, f2p - f2), (0, 0))).T          # (1, f2p)

    w1s = w1p[:input_dims].astype(compute_dtype)             # (input_dims, f1p)
    w1a = w1p[input_dims:].astype(compute_dtype)             # (n_actions, f1p)
    return (w1s, w1a,
            b1p.astype(jnp.float32),
            w2p.astype(compute_dtype),
            b2p.astype(jnp.float32),
            w3_row.astype(jnp.float32),
            jnp.asarray(b3, jnp.float32).reshape(1, 1))


def critic_forward_ref(state, action, params):
    """Pure-JAX reference (unpadded, f32) for correctness checks."""
    w1, b1, w2, b2, w3, b3 = params
    x = jnp.concatenate([state, action], axis=1)
    h1 = jnp.maximum(x @ w1 + b1, 0.0)
    h2 = jnp.maximum(h1 @ w2 + b2, 0.0)
    return h2 @ w3 + b3


# TODO(synk): TD3's twin critics (Q1, Q2) could be fused into one kernel by
# stacking their fc1/fc2 weights along the output-feature axis (state/action
# streamed from HBM once for both heads); kept single-critic here to match the
# module's forward() exactly.

if __name__ == "__main__":
    B, input_dims, n_actions, fc1_dims, fc2_dims = 2, 16, 4, 32, 32

    key = jax.random.PRNGKey(0)
    k_state, k_action, k_params = jax.random.split(key, 3)

    state = jax.random.normal(k_state, (B, input_dims), jnp.float32)
    action = jax.random.normal(k_action, (B, n_actions), jnp.float32)
    params = init_params(k_params, input_dims, n_actions, fc1_dims, fc2_dims)
    q_ref = critic_forward_ref(state, action, params)

    # f32 path: tight check.
    q_f32 = critic_forward(state, action,
                           prepare_params(params, input_dims, jnp.float32))
    jax.block_until_ready(q_f32)
    assert q_f32.shape == (B, 1)
    assert jnp.allclose(q_f32, q_ref, atol=1e-3, rtol=1e-3), (q_f32, q_ref)

    # bf16 path (default, halves activation HBM traffic): looser tolerance.
    q_bf16 = critic_forward(state, action, prepare_params(params, input_dims))
    jax.block_until_ready(q_bf16)
    assert q_bf16.shape == (B, 1)
    assert jnp.allclose(q_bf16, q_ref, atol=5e-2, rtol=5e-2), (q_bf16, q_ref)

    print("KERNEL_OK")
</pallas_src>

<mosaic_0001>
module attributes {stable_mosaic.version = 11 : i64} {
  func.func @critic_kernel(%arg0: i32, %arg1: memref<8x16xf32, #tpu.memory_space<vmem>>, %arg2: memref<8x4xf32, #tpu.memory_space<vmem>>, %arg3: memref<16x128xf32, #tpu.memory_space<vmem>>, %arg4: memref<4x128xf32, #tpu.memory_space<vmem>>, %arg5: memref<1x128xf32, #tpu.memory_space<vmem>>, %arg6: memref<128x128xf32, #tpu.memory_space<vmem>>, %arg7: memref<1x128xf32, #tpu.memory_space<vmem>>, %arg8: memref<1x128xf32, #tpu.memory_space<vmem>>, %arg9: memref<1x1xf32, #tpu.memory_space<smem>>, %arg10: memref<1x1x8xf32, #tpu.memory_space<vmem>>) attributes {dimension_semantics = [#tpu.dimension_semantics<parallel>], iteration_bounds = array<i64: 1>, scalar_prefetch = 0 : i64, scratch_operands = 0 : i64, tpu.core_type = #tpu.core_type<tc>, window_params = [{transform_indices = @transform_0, window_bounds = array<i64: 8, 16>}, {transform_indices = @transform_1, window_bounds = array<i64: 8, 4>}, {pipeline_mode = #tpu.pipeline_mode<synchronous>, transform_indices = @transform_2, window_bounds = array<i64: 16, 128>}, {pipeline_mode = #tpu.pipeline_mode<synchronous>, transform_indices = @transform_3, window_bounds = array<i64: 4, 128>}, {pipeline_mode = #tpu.pipeline_mode<synchronous>, transform_indices = @transform_4, window_bounds = array<i64: 1, 128>}, {pipeline_mode = #tpu.pipeline_mode<synchronous>, transform_indices = @transform_5, window_bounds = array<i64: 128, 128>}, {pipeline_mode = #tpu.pipeline_mode<synchronous>, transform_indices = @transform_6, window_bounds = array<i64: 1, 128>}, {pipeline_mode = #tpu.pipeline_mode<synchronous>, transform_indices = @transform_7, window_bounds = array<i64: 1, 128>}, {transform_indices = @transform_8, window_bounds = array<i64: 1, 1>}, {transform_indices = @transform_9, window_bounds = array<i64: 1, 1, 8>}]} {
    %c0 = arith.constant 0 : index
    %c0_0 = arith.constant 0 : index
    %0 = vector.load %arg1[%c0, %c0_0] : memref<8x16xf32, #tpu.memory_space<vmem>>, vector<8x16xf32>
    %c0_1 = arith.constant 0 : index
    %c0_2 = arith.constant 0 : index
    %1 = vector.load %arg3[%c0_1, %c0_2] : memref<16x128xf32, #tpu.memory_space<vmem>>, vector<16x128xf32>
    %cst = arith.constant dense<0.000000e+00> : vector<8x128xf32>
    %2 = tpu.matmul %0, %1, %cst {dimension_numbers = #tpu.dot_dimension_numbers<[1], [0], [0], [1], [0, 0, 1, 1], [], []>} : vector<8x16xf32>, vector<16x128xf32>, vector<8x128xf32> -> vector<8x128xf32>
    %c0_3 = arith.constant 0 : index
    %c0_4 = arith.constant 0 : index
    %3 = vector.load %arg2[%c0_3, %c0_4] : memref<8x4xf32, #tpu.memory_space<vmem>>, vector<8x4xf32>
    %c0_5 = arith.constant 0 : index
    %c0_6 = arith.constant 0 : index
    %4 = vector.load %arg4[%c0_5, %c0_6] : memref<4x128xf32, #tpu.memory_space<vmem>>, vector<4x128xf32>
    %cst_7 = arith.constant dense<0.000000e+00> : vector<8x128xf32>
    %5 = tpu.matmul %3, %4, %cst_7 {dimension_numbers = #tpu.dot_dimension_numbers<[1], [0], [0], [1], [0, 0, 1, 1], [], []>} : vector<8x4xf32>, vector<4x128xf32>, vector<8x128xf32> -> vector<8x128xf32>
    %6 = arith.addf %2, %5 : vector<8x128xf32>
    %c0_8 = arith.constant 0 : index
    %c0_9 = arith.constant 0 : index
    %7 = vector.load %arg5[%c0_8, %c0_9] : memref<1x128xf32, #tpu.memory_space<vmem>>, vector<1x128xf32>
    %8 = vector.broadcast %7 : vector<1x128xf32> to vector<8x128xf32>
    %9 = arith.addf %6, %8 : vector<8x128xf32>
    %cst_10 = arith.constant 0.000000e+00 : f32
    %10 = vector.broadcast %cst_10 : f32 to vector<8x128xf32>
    %11 = arith.maximumf %9, %10 : vector<8x128xf32>
    %c0_11 = arith.constant 0 : index
    %c0_12 = arith.constant 0 : index
    %12 = vector.load %arg6[%c0_11, %c0_12] : memref<128x128xf32, #tpu.memory_space<vmem>>, vector<128x128xf32>
    %cst_13 = arith.constant dense<0.000000e+00> : vector<8x128xf32>
    %13 = tpu.matmul %11, %12, %cst_13 {dimension_numbers = #tpu.dot_dimension_numbers<[1], [0], [0], [1], [0, 0, 1, 1], [], []>} : vector<8x128xf32>, vector<128x128xf32>, vector<8x128xf32> -> vector<8x128xf32>
    %c0_14 = arith.constant 0 : index
    %c0_15 = arith.constant 0 : index
    %14 = vector.load %arg7[%c0_14, %c0_15] : memref<1x128xf32, #tpu.memory_space<vmem>>, vector<1x128xf32>
    %15 = vector.broadcast %14 : vector<1x128xf32> to vector<8x128xf32>
    %16 = arith.addf %13, %15 : vector<8x128xf32>
    %cst_16 = arith.constant 0.000000e+00 : f32
    %17 = vector.broadcast %cst_16 : f32 to vector<8x128xf32>
    %18 = arith.maximumf %16, %17 : vector<8x128xf32>
    %c0_17 = arith.constant 0 : index
    %c0_18 = arith.constant 0 : index
    %19 = vector.load %arg8[%c0_17, %c0_18] : memref<1x128xf32, #tpu.memory_space<vmem>>, vector<1x128xf32>
    %cst_19 = arith.constant dense<0.000000e+00> : vector<1x8xf32>
    %20 = tpu.matmul %19, %18, %cst_19 {dimension_numbers = #tpu.dot_dimension_numbers<[1], [1], [0], [0], [0, 0, 1, 0], [], []>} : vector<1x128xf32>, vector<8x128xf32>, vector<1x8xf32> -> vector<1x8xf32>
    %c0_20 = arith.constant 0 : index
    %c0_21 = arith.constant 0 : index
    %21 = memref.load %arg9[%c0_20, %c0_21] : memref<1x1xf32, #tpu.memory_space<smem>>
    %22 = vector.broadcast %21 : f32 to vector<1x8xf32>
    %23 = arith.addf %20, %22 : vector<1x8xf32>
    %24 = vector.shape_cast %23 : vector<1x8xf32> to vector<1x1x8xf32>
    %c0_22 = arith.constant 0 : index
    %c0_23 = arith.constant 0 : index
    %c0_24 = arith.constant 0 : index
    %25 = vector.load %arg10[%c0_22, %c0_23, %c0_24] : memref<1x1x8xf32, #tpu.memory_space<vmem>>, vector<1x1x8xf32>
    tpu.vector_store %arg10[%c0_22, %c0_23, %c0_24], %24 {strides = array<i32>} : memref<1x1x8xf32, #tpu.memory_space<vmem>>, vector<1x1x8xf32>,
    return
  }
  func.func @transform_0(%arg0: i32) -> (i32, i32) {
    %c0_i32 = arith.constant 0 : i32
    %c0_i32_0 = arith.constant 0 : i32
    return %arg0, %c0_i32 : i32, i32
  }
  func.func @transform_1(%arg0: i32) -> (i32, i32) {
    %c0_i32 = arith.constant 0 : i32
    %c0_i32_0 = arith.constant 0 : i32
    return %arg0, %c0_i32 : i32, i32
  }
  func.func @transform_2(%arg0: i32) -> (i32, i32) {
    %c0_i32 = arith.constant 0 : i32
    %c0_i32_0 = arith.constant 0 : i32
    %c0_i32_1 = arith.constant 0 : i32
    return %c0_i32, %c0_i32_0 : i32, i32
  }
  func.func @transform_3(%arg0: i32) -> (i32, i32) {
    %c0_i32 = arith.constant 0 : i32
    %c0_i32_0 = arith.constant 0 : i32
    %c0_i32_1 = arith.constant 0 : i32
    return %c0_i32, %c0_i32_0 : i32, i32
  }
  func.func @transform_4(%arg0: i32) -> (i32, i32) {
    %c0_i32 = arith.constant 0 : i32
    %c0_i32_0 = arith.constant 0 : i32
    %c0_i32_1 = arith.constant 0 : i32
    return %c0_i32, %c0_i32_0 : i32, i32
  }
  func.func @transform_5(%arg0: i32) -> (i32, i32) {
    %c0_i32 = arith.constant 0 : i32
    %c0_i32_0 = arith.constant 0 : i32
    %c0_i32_1 = arith.constant 0 : i32
    return %c0_i32, %c0_i32_0 : i32, i32
  }
  func.func @transform_6(%arg0: i32) -> (i32, i32) {
    %c0_i32 = arith.constant 0 : i32
    %c0_i32_0 = arith.constant 0 : i32
    %c0_i32_1 = arith.constant 0 : i32
    return %c0_i32, %c0_i32_0 : i32, i32
  }
  func.func @transform_7(%arg0: i32) -> (i32, i32) {
    %c0_i32 = arith.constant 0 : i32
    %c0_i32_0 = arith.constant 0 : i32
    %c0_i32_1 = arith.constant 0 : i32
    return %c0_i32, %c0_i32_0 : i32, i32
  }
  func.func @transform_8(%arg0: i32) -> (i32, i32) {
    %c0_i32 = arith.constant 0 : i32
    %c0_i32_0 = arith.constant 0 : i32
    %c0_i32_1 = arith.constant 0 : i32
    return %c0_i32, %c0_i32_0 : i32, i32
  }
  func.func @transform_9(%arg0: i32) -> (i32, i32, i32) {
    %c0_i32 = arith.constant 0 : i32
    %c0_i32_0 = arith.constant 0 : i32
    %c0_i32_1 = arith.constant 0 : i32
    return %arg0, %c0_i32, %c0_i32_0 : i32, i32, i32
  }
}

</mosaic_0001>

<bundles_post_ra>
// kernel: tpu_custom_call.1
= control target key start
LH: loop header
LB: loop body
LE: loop exit
PB: predicated region body
PF: predicated region fallthrough
CT: control target
= control target key end

     0   :  { %15 = vsyncpa [#allocation4], 0  ;;  %s728_s0 = inlined_call_operand.hbm [shape: f32[8,16], index: 0, kind: input, shape index: {}]   ;;  %s729_s1 = inlined_call_operand.vmem [shape: f32[8,4], index: 1, kind: input, shape index: {}]   ;;  %s730_s2 = inlined_call_operand.vmem [shape: f32[16,128], index: 2, kind: input, shape index: {}]   ;;  %s731_s3 = inlined_call_operand.vmem [shape: f32[4,128], index: 3, kind: input, shape index: {}]   ;;  %s732_s4 = inlined_call_operand.vmem [shape: f32[1,128], index: 4, kind: input, shape index: {}]   ;;  %s733_s5 = inlined_call_operand.hbm [shape: f32[128,128], index: 5, kind: input, shape index: {}]   ;;  %s734_s6 = inlined_call_operand.vmem [shape: f32[1,128], index: 6, kind: input, shape index: {}]   ;;  %s735_s7 = inlined_call_operand.vmem [shape: f32[1,128], index: 7, kind: input, shape index: {}]   ;;  %s736_s8 = inlined_call_operand.<no memory space> [shape: f32[1,1], index: 8, kind: input, shape index: {}]   ;;  %s737_s9 = inlined_call_operand.hbm [shape: f32[1,1,8], index: 9, kind: output, shape index: {}]  }
   0x1   :  { %16 = vsyncpa [#allocation7], 0 }
   0x2   :  { %17 = vsyncpa [#allocation5], 0  ;;  %s599_s30 = smov [#allocation3]   ;;  %s600_s11 = smov [#allocation6]  }
   0x3   :  { %s24_s10 = sshll.u32 %s599_s30, 4  ;;  %s41_s12 = sshll.u32 %s600_s11, 4  ;;  %s25_s10 = int_to_ptr.vmem [resolvable:$true] %s24_s10  ;;  %s657_s12 = int_to_ptr.vmem [resolvable:$true] %s41_s12 }
   0x4   :  { %s527_s15 = scalar_lea.hbm %s728_s0, 128 }
   0x5   :  { %p528_p0 = scmp.ne.s32.totalorder %s728_s0, %s527_s15  ;;  %p531_p1 = scmp.lt.u32.totalorder %s527_s15, %s728_s0 }
   0x7   :  { %p533_p2 = pnand %p531_p1, %p528_p0 }
   0x9   :  { %536 = shalt.err (!%p533_p2)
}
   0xa   :  { %s537_s20 = scalar_lea.vmem %s25_s10, 128  ;;  %p542_p4 = scmp.lt.s32.totalorder %s25_s10, %s25_s10 }
   0xb   :  { %p538_p3 = scmp.ne.s32.totalorder %s25_s10, %s537_s20  ;;  %p543_p5 = scmp.lt.s32.totalorder %s537_s20, %s537_s20 }
   0xd   :  { %p544_p6 = por %p543_p5, %p542_p4 }
   0xf   :  { %p545_p7 = pnand %p544_p6, %p538_p3 }
  0x11   :  { %548 = shalt.err (!%p545_p7)
}
  0x12   :  { %27 = dma.hbm_to_vmem [thread:$0]  %s728_s0, 128, %s25_s10, [#allocation4]  }
  0x13   :  { %s549_s25 = scalar_lea.hbm %s733_s5, 2048 }
  0x14   :  { %p550_p8 = scmp.ne.s32.totalorder %s733_s5, %s549_s25  ;;  %p553_p9 = scmp.lt.u32.totalorder %s549_s25, %s733_s5 }
  0x16   :  { %p555_p10 = pnand %p553_p9, %p550_p8 }
  0x18   :  { %558 = shalt.err (!%p555_p10)
}
  0x19   :  { %s559_s30 = scalar_lea.vmem %s657_s12, 2048  ;;  %p564_p12 = scmp.lt.s32.totalorder %s657_s12, %s657_s12 }
  0x1a   :  { %p560_p11 = scmp.ne.s32.totalorder %s657_s12, %s559_s30  ;;  %p565_p13 = scmp.lt.s32.totalorder %s559_s30, %s559_s30 }
  0x1c   :  { %p566_p0 = por %p565_p13, %p564_p12 }
  0x1e   :  { %p567_p1 = pnand %p566_p0, %p560_p11 }
  0x20   :  { %570 = shalt.err (!%p567_p1)
}
  0x21   :  { %s601_s0 = smov 128   ;;  %s602_s10 = smov 8  }
  0x22   :  { %47 = dma.hbm_to_vmem [thread:$0]  %s733_s5, 2048, %s657_s12, [#allocation7], %s601_s0, %s601_s0, %s602_s10  }
  0x23   :  { %593 = dma.done.wait [#allocation4], 128  }
  0x24   :  { %594 = vsyncadd [#allocation4], 4294967168 }
  0x25   :  { %595 = dma.done.wait [#allocation7], 2048  }
  0x26   :  { %596 = vsyncadd [#allocation7], 4294965248  ;;  %v603_v0 = vmov 0.0   ;;  %vm604_vm0 = vmmov 0   ;;  %v605_v1 = vmov 0.0|0.0   ;;  %vm69_vm1 = vcmask 1043456  }
  0x27   :  { %440 = vmatprep.subr.mxu1 %v603_v0  ;;  %442 = vmatprep.mubr.msk.f32.mxu1 %vm604_vm0, %v603_v0  ;;  %vm65_vm2 = vcmask 31744   ;;  %v64_v2 = vld [vmem:[%s731_s3] sm:$0xf]  ;;  %v62_v5 = vld [vmem:[%s730_s2 + $0x8] sm:$0xff]  ;;  %v227_v8 = vld [vmem:[#allocation6 + $0x8] sm:$0xff]  ;;  %vm143_vm3 = vcmask 130048   ;;  %v322_v46 = vstv %s736_s8 }
  0x28   :  { %495 = vmatprep.subr.bf16.mxu0 %v605_v1  ;;  %484 = vmatprep.mubr.msk.f32.mxu0 %vm604_vm0, %v603_v0  ;;  %v63_v3 = vld [vmem:[%s729_s1] sm:$0xff]  ;;  %v226_v6 = vld [vmem:[#allocation6] sm:$0xff]  ;;  %v228_v9 = vld [vmem:[#allocation6 + $0x10] sm:$0xff]  ;;  %s606_s24 = smov [#allocation8]   ;;  %vm393_vm4 = vcmask 57344  }
  0x29   :  { %v61_v4 = vld [vmem:[%s730_s2] sm:$0xff]  ;;  %441 = vmatpush3.msk.msra.mxu1 %vm69_vm1, %v64_v2  ;;  %v496_v11 = vpack.c.bf16 %v227_v8, %v226_v6  ;;  %v230_v14 = vld [vmem:[#allocation6 + $0x20] sm:$0xff]  ;;  %v231_v15 = vld [vmem:[#allocation6 + $0x28] sm:$0xff]  ;;  %s401_s25 = sshll.u32 %s606_s24, 4  ;;  %s402_s25 = int_to_ptr.vmem [resolvable:$true] %s401_s25 }
  0x2a   :  { %443 = vmatmul.mubr.msk.f32.vlgmr.msra.gmra.mrb[0].mxu1 %vm65_vm2, %v63_v3  ;;  %492 = vmatprep.subr.bf16.mxu1 %v605_v1  ;;  %v493_v7 = vpack.c.bf16 %v62_v5, %v61_v4  ;;  %v229_v10 = vld [vmem:[#allocation6 + $0x18] sm:$0xff]  ;;  %v502_v16 = vpack.c.bf16 %v231_v15, %v230_v14  ;;  %v232_v17 = vld [vmem:[#allocation6 + $0x30] sm:$0xff]  ;;  %v234_v20 = vld [vmem:[#allocation6 + $0x40] sm:$0xff]  ;;  %s575_s26 = scalar_lea.vmem %s402_s25, 32  ;;  %p576_p3 = scmp.lt.s32.totalorder %s402_s25, %s402_s25 }
  0x2b   :  { %449 = vmatprep.mubr.msk.f32.mxu1 %vm604_vm0, %v603_v0  ;;  %v60_v12 = vld [vmem:[#allocation3] sm:$0xff]  ;;  %497 = vmatpush3.bf16.msra.mxu0 %v496_v11  ;;  %v499_v13 = vpack.c.bf16 %v229_v10, %v228_v9  ;;  %v235_v21 = vld [vmem:[#allocation6 + $0x48] sm:$0xff]  ;;  %v236_v23 = vld [vmem:[#allocation6 + $0x50] sm:$0xff] }
  0x2c   :  { %494 = vmatpush3.bf16.msra.mxu1 %v493_v7  ;;  %498 = vmatprep.subr.bf16.mxu0 %v605_v1  ;;  %v233_v18 = vld [vmem:[#allocation6 + $0x38] sm:$0xff]  ;;  %v508_v22 = vpack.c.bf16 %v235_v21, %v234_v20  ;;  %v238_v26 = vld [vmem:[#allocation6 + $0x60] sm:$0xff]  ;;  %v239_v27 = vld [vmem:[#allocation6 + $0x68] sm:$0xff] }
  0x2d   :  { %487 = vmatprep.subr.mxu1 %v603_v0  ;;  %v505_v19 = vpack.c.bf16 %v233_v18, %v232_v17  ;;  %v237_v24 = vld [vmem:[#allocation6 + $0x58] sm:$0xff]  ;;  %v514_v28 = vpack.c.bf16 %v239_v27, %v238_v26  ;;  %v240_v29 = vld [vmem:[#allocation6 + $0x70] sm:$0xff] }
  0x2e   :  { %v511_v25 = vpack.c.bf16 %v237_v24, %v236_v23  ;;  %v241_v30 = vld [vmem:[#allocation6 + $0x78] sm:$0xff] }
  0x2f   :  { %450 = vmatmul.mubr.msk.f32.vlgmr.msra.gmra.mrb[2].mxu1 %vm143_vm3, %v60_v12  ;;  %500 = vmatpush3.bf16.msra.mxu0 %v499_v13  ;;  %v517_v31 = vpack.c.bf16 %v241_v30, %v240_v29  ;;  %v414_v35 = vld [vmem:[%s732_s4] ss:$0 sm:$0xff] }
  0x30   :  { %489 = vmatprep.mubr.msk.f32.mxu1 %vm604_vm0, %v603_v0  ;;  %501 = vmatprep.subr.bf16.mxu0 %v605_v1  ;;  %v415_v40 = vld [vmem:[%s734_s6] ss:$0 sm:$0xff]  ;;  %s571_s6 = scalar_lea.vmem %s402_s25, 16 }
  0x31   :  { %v320_v45 = vld [vmem:[%s735_s7] sm:$0x1]  ;;  %p572_p2 = scmp.ne.s32.totalorder %s402_s25, %s571_s6  ;;  %p577_p4 = scmp.lt.s32.totalorder %s575_s26, %s571_s6 }
  0x33   :  { %503 = vmatpush3.bf16.msra.mxu0 %v502_v16  ;;  %p578_p5 = por %p577_p4, %p576_p3 }
  0x34   :  { %504 = vmatprep.subr.bf16.mxu0 %v605_v1 }
  0x35   :  { %p579_p6 = pnand %p578_p5, %p572_p2 }
  0x37   :  { %506 = vmatpush3.bf16.msra.mxu0 %v505_v19 }
  0x38   :  { %507 = vmatprep.subr.bf16.mxu0 %v605_v1 }
  0x3b   :  { %509 = vmatpush3.bf16.msra.mxu0 %v508_v22 }
  0x3c   :  { %510 = vmatprep.subr.bf16.mxu0 %v605_v1 }
  0x3f   :  { %512 = vmatpush3.bf16.msra.mxu0 %v511_v25 }
  0x40   :  { %513 = vmatprep.subr.bf16.mxu0 %v605_v1 }
  0x43   :  { %515 = vmatpush3.bf16.msra.mxu0 %v514_v28 }
  0x44   :  { %516 = vmatprep.subr.bf16.mxu0 %v605_v1 }
  0x47   :  { %518 = vmatpush3.bf16.msra.mxu0 %v517_v31 }
  0xfd   :  { %v139_v32 = vpop.f32.mrb[0].mxu1 }
  0xfe   :  { %v444_v33 = vpop.f32.mrb[1].mxu1 }
 0x102   :  { %v213_v34 = vpop.f32.mrb[2].mxu1 }
 0x103   :  { %v214_v36 = vadd.f32 %v213_v34, %v139_v32  ;;  %v451_v37 = vpop.f32.mrb[3].mxu1 }
 0x105   :  { %v224_v38 = vadd.f32 %v414_v35, %v214_v36 }
 0x107   :  { %v225_v39 = vmax.f32 %v224_v38, 0.0 }
 0x109   :  { %485 = vmatmul.mubr.f32.vlgmr.msra.gmra.mrb[0].mxu0 %v225_v39 }
 0x1dc   :  { %v315_v41 = vpop.f32.mrb[0].mxu0 }
 0x1dd   :  { %v316_v42 = vadd.f32 %v415_v40, %v315_v41  ;;  %v486_v43 = vpop.f32.mrb[1].mxu0 }
 0x1df   :  { %v319_v44 = vmax.f32 %v316_v42, 0.0 }
 0x1e1   :  { %488 = vmatpush3.xpose.msra.mxu1 %v319_v44 }
 0x1e4   :  { %490 = vmatmul.mubr.f32.vlgmr.msra.gmra.mrb[4].mxu1 %v320_v45 }
 0x2b7   :  { %v389_v47 = vpop.f32.mrb[4].mxu1 }
 0x2b8   :  { %v390_v48 = vadd.f32 %v389_v47, %v322_v46  ;;  %v491_v49 = vpop.f32.mrb[5].mxu1 }
 0x2ba   :  { %394 = vst.msk [vmem:[#allocation8] sm:$0x1] %vm393_vm4, %v390_v48 }
 0x2bb   :  { %582 = shalt.err (!%p579_p6)
}
 0x2bc   :  { %s583_s8 = scalar_lea.hbm %s737_s9, 16 }
 0x2bd   :  { %p584_p7 = scmp.ne.s32.totalorder %s737_s9, %s583_s8  ;;  %p587_p8 = scmp.lt.u32.totalorder %s583_s8, %s737_s9 }
 0x2bf   :  { %p589_p9 = pnand %p587_p8, %p584_p7 }
 0x2c1   :  { %592 = shalt.err (!%p589_p9)
}
 0x2c2   :  { %404 = dma.vmem_to_hbm [thread:$0]  %s402_s25, 16, %s737_s9, [#allocation5]  }
 0x2c3   :  { %597 = dma.done.wait [#allocation5], 16  }
 0x2c4   :  { %598 = vsyncadd [#allocation5], 4294967280 }
 0x2c5   :  { %408 = vsyncpa [#allocation4], 1 }
 0x2c6   :  { %409 = vsyncpa [#allocation7], 1 }
 0x2c7   :  { %410 = vsyncpa [#allocation5], 1 }

</bundles_post_ra>
